<compile_context>
chip_gen: v6e
topology: v6e:2x2x1
jax: 0.10.0
libtpu: 0.0.40
codegen_flags: <defaults>
</compile_context>

<pallas_src>
import functools

import jax
import jax.numpy as jnp
import numpy as np
from jax.experimental import pallas as pl
from jax.experimental.pallas import tpu as pltpu


def _round_up(x, m):
    return ((x + m - 1) // m) * m


# ----------------------------------------------------------------------------
# Pallas kernel: fused pointwise MLP (2 layers, ReLU) + max over neighbours
# ----------------------------------------------------------------------------
def _mlp_max_kernel(x_ref, w1_ref, b1_ref, w2_ref, b2_ref, o_ref, *, nsample):
    # x_ref : (rows_blk * K, Cin_pad)  bf16   rows are (centroid-major, neighbour-minor)
    # w1    : (Cin_pad, C1) bf16, b1 : (1, C1) f32
    # w2    : (C1, C2)      bf16, b2 : (1, C2) f32
    # o_ref : (rows_blk, C2) f32
    x = x_ref[...]
    h = jnp.dot(x, w1_ref[...], preferred_element_type=jnp.float32)
    h = jnp.maximum(h + b1_ref[...], 0.0)
    h = jnp.dot(h.astype(jnp.bfloat16), w2_ref[...], preferred_element_type=jnp.float32)
    h = jnp.maximum(h + b2_ref[...], 0.0)                    # (rows_blk*K, C2) f32
    rk, c2 = h.shape
    h = h.reshape(rk // nsample, nsample, c2)                 # group neighbours
    o_ref[...] = jnp.max(h, axis=1).astype(o_ref.dtype)       # max-pool over K


def sa_mlp_max(grouped, w1, b1, w2, b2, *, rows_blk=256):
    """grouped: [B, S, K, Cin] f32 -> [B, S, C2] f32 via Pallas."""
    B, S, K, Cin = grouped.shape
    C1 = w1.shape[1]
    C2 = w2.shape[1]
    R = B * S

    # pad the contraction dim to a multiple of 8 (clean sublane-packed layout)
    Cin_pad = max(8, _round_up(Cin, 8))

    # choose a row tile: ~256 centroid groups per grid step, multiple of 8
    rows_blk = min(rows_blk, _round_up(R, 8))
    rows_blk = _round_up(rows_blk, 8)
    R_pad = _round_up(R, rows_blk)

    # flatten (free reshape, no transpose) + bf16 cast + zero padding
    x = grouped.astype(jnp.bfloat16).reshape(R * K, Cin)
    if Cin_pad != Cin:
        x = jnp.pad(x, ((0, 0), (0, Cin_pad - Cin)))
    if R_pad != R:
        x = jnp.pad(x, ((0, (R_pad - R) * K), (0, 0)))

    w1p = w1.astype(jnp.bfloat16)
    if Cin_pad != Cin:
        w1p = jnp.pad(w1p, ((0, Cin_pad - Cin), (0, 0)))
    w2p = w2.astype(jnp.bfloat16)
    b1p = b1.astype(jnp.float32).reshape(1, C1)
    b2p = b2.astype(jnp.float32).reshape(1, C2)

    kernel = functools.partial(_mlp_max_kernel, nsample=K)
    flops = 2 * R_pad * K * (Cin_pad * C1 + C1 * C2)
    bytes_accessed = (
        x.size * 2 + w1p.size * 2 + w2p.size * 2 + b1p.size * 4 + b2p.size * 4
        + R_pad * C2 * 4
    )

    out = pl.pallas_call(
        kernel,
        out_shape=jax.ShapeDtypeStruct((R_pad, C2), jnp.float32),
        grid=(R_pad // rows_blk,),
        in_specs=[
            pl.BlockSpec((rows_blk * K, Cin_pad), lambda r: (r, 0)),
            pl.BlockSpec((Cin_pad, C1), lambda r: (0, 0)),
            pl.BlockSpec((1, C1), lambda r: (0, 0)),
            pl.BlockSpec((C1, C2), lambda r: (0, 0)),
            pl.BlockSpec((1, C2), lambda r: (0, 0)),
        ],
        out_specs=pl.BlockSpec((rows_blk, C2), lambda r: (r, 0)),
        compiler_params=pltpu.CompilerParams(dimension_semantics=("parallel",)),
        cost_estimate=pl.CostEstimate(
            flops=flops, transcendentals=0, bytes_accessed=bytes_accessed
        ),
    )(x, w1p, b1p, w2p, b2p)

    return out[:R].reshape(B, S, C2)


# ----------------------------------------------------------------------------
# Plain-JAX glue: FPS sampling, kNN grouping (data-dependent gathers)
# ----------------------------------------------------------------------------
def square_distance(src, dst):
    # src: [B, N, C], dst: [B, M, C] -> [B, N, M]
    return (
        jnp.sum(src ** 2, axis=-1, keepdims=True)
        + jnp.sum(dst ** 2, axis=-1)[:, None, :]
        - 2.0 * jnp.einsum("bnc,bmc->bnm", src, dst)
    )


def farthest_point_sample(xyz, npoint):
    B, N, _ = xyz.shape

    def body(i, state):
        centroids, distance, farthest = state
        centroids = centroids.at[:, i].set(farthest)
        centroid = jnp.take_along_axis(xyz, farthest[:, None, None], axis=1)  # (B,1,3)
        dist = jnp.sum((xyz - centroid) ** 2, axis=-1)
        distance = jnp.minimum(distance, dist)
        farthest = jnp.argmax(distance, axis=-1).astype(jnp.int32)
        return centroids, distance, farthest

    centroids = jnp.zeros((B, npoint), dtype=jnp.int32)
    distance = jnp.full((B, N), 1e10, dtype=xyz.dtype)
    farthest = jnp.zeros((B,), dtype=jnp.int32)  # deterministic start
    centroids, _, _ = jax.lax.fori_loop(0, npoint, body, (centroids, distance, farthest))
    return centroids


def index_points(points, idx):
    # points: [B, N, C]; idx: [B, ...] -> [B, ..., C]
    B = points.shape[0]
    C = points.shape[-1]
    flat_idx = idx.reshape(B, -1)
    gathered = jnp.take_along_axis(points, flat_idx[..., None], axis=1)
    return gathered.reshape(idx.shape + (C,))


def sample_and_group_knn(npoint, nsample, xyz, points):
    fps_idx = farthest_point_sample(xyz, npoint)            # [B, S]
    new_xyz = index_points(xyz, fps_idx)                     # [B, S, 3]
    dists = square_distance(new_xyz, xyz)                    # [B, S, N]
    _, idx = jax.lax.top_k(-dists, nsample)                  # [B, S, K] nearest neighbours
    grouped_xyz = index_points(xyz, idx)                     # [B, S, K, 3]
    grouped_xyz_norm = grouped_xyz - new_xyz[:, :, None, :]
    grouped_points = index_points(points, idx)               # [B, S, K, D]
    new_points = jnp.concatenate([grouped_xyz_norm, grouped_points], axis=-1)  # [B,S,K,3+D]
    return new_xyz, new_points


# ----------------------------------------------------------------------------
# TransitionDown forward
# ----------------------------------------------------------------------------
def transition_down_forward(xyz, points, params, *, npoint, nsample):
    new_xyz, grouped = sample_and_group_knn(npoint, nsample, xyz, points)
    new_points = sa_mlp_max(
        grouped, params["w1"], params["b1"], params["w2"], params["b2"]
    )
    return new_xyz, new_points


def make_params(channels, key):
    # channels = [Cin, C1, C2]; Conv2d(1x1) + BatchNorm2d (eval) folded per layer.
    Cin, C1, C2 = channels
    eps = 1e-5
    keys = jax.random.split(key, 8)

    def layer(kw, kb, kg, kbeta, cin, cout):
        w = 0.1 * jax.random.normal(kw, (cin, cout), jnp.float32)
        b = 0.1 * jax.random.normal(kb, (1, cout), jnp.float32)
        gamma = 1.0 + 0.1 * jax.random.normal(kg, (1, cout), jnp.float32)
        beta = 0.1 * jax.random.normal(kbeta, (1, cout), jnp.float32)
        scale = gamma / jnp.sqrt(1.0 + eps)        # running_var = 1, running_mean = 0
        return w * scale, b * scale + beta

    w1, b1 = layer(keys[0], keys[1], keys[2], keys[3], Cin, C1)
    w2, b2 = layer(keys[4], keys[5], keys[6], keys[7], C1, C2)
    return {"w1": w1, "b1": b1, "w2": w2, "b2": b2}


# ----------------------------------------------------------------------------
# Pure-JAX reference (mirrors the kernel's bf16-in / f32-accumulate scheme)
# ----------------------------------------------------------------------------
def reference_mlp_max(grouped, params):
    x = grouped.astype(jnp.bfloat16)
    h = jnp.einsum(
        "bskc,cd->bskd", x, params["w1"].astype(jnp.bfloat16),
        preferred_element_type=jnp.float32,
    ) + params["b1"]
    h = jnp.maximum(h, 0.0)
    h = jnp.einsum(
        "bskc,cd->bskd", h.astype(jnp.bfloat16), params["w2"].astype(jnp.bfloat16),
        preferred_element_type=jnp.float32,
    ) + params["b2"]
    h = jnp.maximum(h, 0.0)
    return jnp.max(h, axis=2)  # [B, S, C2]


if __name__ == "__main__":
    # Small config consistent with TransitionDown(k, nneighbor, channels):
    #   k (npoint) = 16, nneighbor = 16, channels = [3 + D, 64, 128] with D = 32.
    B, N, D = 2, 64, 32
    npoint, nsample = 16, 16
    channels = [3 + D, 64, 128]

    key = jax.random.PRNGKey(0)
    k_xyz, k_pts, k_par = jax.random.split(key, 3)
    xyz = jax.random.normal(k_xyz, (B, N, 3), jnp.float32)
    points = jax.random.normal(k_pts, (B, N, D), jnp.float32)
    params = make_params(channels, k_par)

    new_xyz, new_points = transition_down_forward(
        xyz, points, params, npoint=npoint, nsample=nsample
    )
    new_xyz = jax.block_until_ready(new_xyz)
    new_points = jax.block_until_ready(new_points)

    # sanity check against a pure-JAX reference of the hot path
    _, grouped = sample_and_group_knn(npoint, nsample, xyz, points)
    ref = reference_mlp_max(grouped, params)
    assert new_xyz.shape == (B, npoint, 3)
    assert new_points.shape == (B, npoint, channels[-1])
    np.testing.assert_allclose(
        np.asarray(new_points), np.asarray(ref), rtol=2e-2, atol=2e-2
    )

    print("KERNEL_OK")
</pallas_src>

<mosaic_0001>
module attributes {stable_mosaic.version = 11 : i64} {
  func.func @_mlp_max_kernel(%arg0: i32, %arg1: memref<512x40xbf16, #tpu.memory_space<vmem>>, %arg2: memref<40x64xbf16, #tpu.memory_space<vmem>>, %arg3: memref<1x64xf32, #tpu.memory_space<vmem>>, %arg4: memref<64x128xbf16, #tpu.memory_space<vmem>>, %arg5: memref<1x128xf32, #tpu.memory_space<vmem>>, %arg6: memref<32x128xf32, #tpu.memory_space<vmem>>) attributes {dimension_semantics = [#tpu.dimension_semantics<parallel>], iteration_bounds = array<i64: 1>, scalar_prefetch = 0 : i64, scratch_operands = 0 : i64, tpu.core_type = #tpu.core_type<tc>, window_params = [{transform_indices = @transform_0, window_bounds = array<i64: 512, 40>}, {pipeline_mode = #tpu.pipeline_mode<synchronous>, transform_indices = @transform_1, window_bounds = array<i64: 40, 64>}, {pipeline_mode = #tpu.pipeline_mode<synchronous>, transform_indices = @transform_2, window_bounds = array<i64: 1, 64>}, {pipeline_mode = #tpu.pipeline_mode<synchronous>, transform_indices = @transform_3, window_bounds = array<i64: 64, 128>}, {pipeline_mode = #tpu.pipeline_mode<synchronous>, transform_indices = @transform_4, window_bounds = array<i64: 1, 128>}, {transform_indices = @transform_5, window_bounds = array<i64: 32, 128>}]} {
    %c0 = arith.constant 0 : index
    %c0_0 = arith.constant 0 : index
    %0 = vector.load %arg1[%c0, %c0_0] : memref<512x40xbf16, #tpu.memory_space<vmem>>, vector<512x40xbf16>
    %c0_1 = arith.constant 0 : index
    %c0_2 = arith.constant 0 : index
    %1 = vector.load %arg2[%c0_1, %c0_2] : memref<40x64xbf16, #tpu.memory_space<vmem>>, vector<40x64xbf16>
    %cst = arith.constant dense<0.000000e+00> : vector<512x64xf32>
    %2 = tpu.matmul %0, %1, %cst {dimension_numbers = #tpu.dot_dimension_numbers<[1], [0], [0], [1], [0, 0, 1, 1], [], []>} : vector<512x40xbf16>, vector<40x64xbf16>, vector<512x64xf32> -> vector<512x64xf32>
    %c0_3 = arith.constant 0 : index
    %c0_4 = arith.constant 0 : index
    %3 = vector.load %arg3[%c0_3, %c0_4] : memref<1x64xf32, #tpu.memory_space<vmem>>, vector<1x64xf32>
    %4 = vector.broadcast %3 : vector<1x64xf32> to vector<512x64xf32>
    %5 = arith.addf %2, %4 : vector<512x64xf32>
    %cst_5 = arith.constant 0.000000e+00 : f32
    %6 = vector.broadcast %cst_5 : f32 to vector<512x64xf32>
    %7 = arith.maximumf %5, %6 : vector<512x64xf32>
    %8 = arith.truncf %7 : vector<512x64xf32> to vector<512x64xbf16>
    %c0_6 = arith.constant 0 : index
    %c0_7 = arith.constant 0 : index
    %9 = vector.load %arg4[%c0_6, %c0_7] : memref<64x128xbf16, #tpu.memory_space<vmem>>, vector<64x128xbf16>
    %cst_8 = arith.constant dense<0.000000e+00> : vector<512x128xf32>
    %10 = tpu.matmul %8, %9, %cst_8 {dimension_numbers = #tpu.dot_dimension_numbers<[1], [0], [0], [1], [0, 0, 1, 1], [], []>} : vector<512x64xbf16>, vector<64x128xbf16>, vector<512x128xf32> -> vector<512x128xf32>
    %c0_9 = arith.constant 0 : index
    %c0_10 = arith.constant 0 : index
    %11 = vector.load %arg5[%c0_9, %c0_10] : memref<1x128xf32, #tpu.memory_space<vmem>>, vector<1x128xf32>
    %12 = vector.broadcast %11 : vector<1x128xf32> to vector<512x128xf32>
    %13 = arith.addf %10, %12 : vector<512x128xf32>
    %cst_11 = arith.constant 0.000000e+00 : f32
    %14 = vector.broadcast %cst_11 : f32 to vector<512x128xf32>
    %15 = arith.maximumf %13, %14 : vector<512x128xf32>
    %16 = vector.shape_cast %15 : vector<512x128xf32> to vector<32x16x128xf32>
    %cst_12 = arith.constant dense<0xFF800000> : vector<32x128xf32>
    %17 = vector.multi_reduction <maximumf>, %16, %cst_12 [1] : vector<32x16x128xf32> to vector<32x128xf32>
    %c0_13 = arith.constant 0 : index
    %c0_14 = arith.constant 0 : index
    %18 = vector.load %arg6[%c0_13, %c0_14] : memref<32x128xf32, #tpu.memory_space<vmem>>, vector<32x128xf32>
    tpu.vector_store %arg6[%c0_13, %c0_14], %17 {strides = array<i32>} : memref<32x128xf32, #tpu.memory_space<vmem>>, vector<32x128xf32>,
    return
  }
  func.func @transform_0(%arg0: i32) -> (i32, i32) {
    %c0_i32 = arith.constant 0 : i32
    %c0_i32_0 = arith.constant 0 : i32
    return %arg0, %c0_i32 : i32, i32
  }
  func.func @transform_1(%arg0: i32) -> (i32, i32) {
    %c0_i32 = arith.constant 0 : i32
    %c0_i32_0 = arith.constant 0 : i32
    %c0_i32_1 = arith.constant 0 : i32
    return %c0_i32, %c0_i32_0 : i32, i32
  }
  func.func @transform_2(%arg0: i32) -> (i32, i32) {
    %c0_i32 = arith.constant 0 : i32
    %c0_i32_0 = arith.constant 0 : i32
    %c0_i32_1 = arith.constant 0 : i32
    return %c0_i32, %c0_i32_0 : i32, i32
  }
  func.func @transform_3(%arg0: i32) -> (i32, i32) {
    %c0_i32 = arith.constant 0 : i32
    %c0_i32_0 = arith.constant 0 : i32
    %c0_i32_1 = arith.constant 0 : i32
    return %c0_i32, %c0_i32_0 : i32, i32
  }
  func.func @transform_4(%arg0: i32) -> (i32, i32) {
    %c0_i32 = arith.constant 0 : i32
    %c0_i32_0 = arith.constant 0 : i32
    %c0_i32_1 = arith.constant 0 : i32
    return %c0_i32, %c0_i32_0 : i32, i32
  }
  func.func @transform_5(%arg0: i32) -> (i32, i32) {
    %c0_i32 = arith.constant 0 : i32
    %c0_i32_0 = arith.constant 0 : i32
    return %arg0, %c0_i32 : i32, i32
  }
}

</mosaic_0001>

<bundles_post_ra>
// kernel: tpu_custom_call.1
= control target key start
LH: loop header
LB: loop body
LE: loop exit
PB: predicated region body
PF: predicated region fallthrough
CT: control target
= control target key end

     0   :  { %vm370_vm0 = vcmask 1043456   ;;  %vm273_vm1 = vcmask 326656   ;;  %s2329_s0 = inlined_call_operand.vmem [shape: bf16[512,40], index: 0, kind: input, shape index: {}]   ;;  %s2330_s1 = inlined_call_operand.vmem [shape: bf16[40,64], index: 1, kind: input, shape index: {}]   ;;  %s2331_s2 = inlined_call_operand.vmem [shape: f32[1,64], index: 2, kind: input, shape index: {}]   ;;  %s2332_s3 = inlined_call_operand.vmem [shape: bf16[64,128], index: 3, kind: input, shape index: {}]   ;;  %s2333_s4 = inlined_call_operand.vmem [shape: f32[1,128], index: 4, kind: input, shape index: {}]   ;;  %s2334_s5 = inlined_call_operand.hbm [shape: f32[32,128], index: 5, kind: output, shape index: {}]  }
   0x1   :  { %v1885_v0 = vld [vmem:[%s2330_s1 + $0x10] ss:$0 sps:$4 sm:$0xff]   ;;  %v1886_v1 = vld [vmem:[%s2330_s1 + $0x8] sm:$0xff]   ;;  %v1888_v3 = vld [vmem:[%s2329_s0] sm:$0xff]  }
   0x2   :  { %1881 = vmatprep.subr.msk.bf16.mxu0 %vm370_vm0, %v1885_v0  ;;  %v372_v2 = vsel %vm370_vm0, %v1885_v0, 0  ;;  %v1887_v4 = vld [vmem:[%s2330_s1] sm:$0xff]   ;;  %1745 = vmatprep.mubr.msk.bf16.mxu0 %vm273_vm1, %v1888_v3  ;;  %v1889_v5 = vld [vmem:[%s2329_s0 + $0x8] sm:$0xff]   ;;  %v1890_v6 = vld [vmem:[%s2329_s0 + $0x10] sm:$0xff]  }
   0x3   :  { %1740 = vmatpush3.bf16.msra.mxu0 %v372_v2  ;;  %v1891_v7 = vld [vmem:[%s2329_s0 + $0x18] sm:$0xff]   ;;  %v1892_v8 = vld [vmem:[%s2329_s0 + $0x20] sm:$0xff]   ;;  %v1893_v9 = vld [vmem:[%s2329_s0 + $0x28] sm:$0xff]  }
   0x4   :  { %1741 = vmatprep.subr.bf16.mxu0 %v1886_v1  ;;  %v1894_v10 = vld [vmem:[%s2329_s0 + $0x30] sm:$0xff]   ;;  %v1895_v11 = vld [vmem:[%s2329_s0 + $0x38] sm:$0xff]   ;;  %v1896_v12 = vld [vmem:[%s2329_s0 + $0x40] sm:$0xff]  }
   0x5   :  { %v1920_v13 = vld [vmem:[%s2332_s3 + $0x18] sm:$0xff]  }
   0x6   :  { %1809 = vmatprep.subr.bf16.mxu1 %v1920_v13 }
   0x7   :  { %1742 = vmatpush3.bf16.msra.mxu0 %v1886_v1 }
   0x8   :  { %1743 = vmatprep.subr.bf16.mxu0 %v1887_v4 }
   0xb   :  { %1744 = vmatpush3.bf16.msra.mxu0 %v1887_v4 }
   0xe   :  { %1746 = vmatmul.mubr.msk.bf16.vlgmr.msra.gmra.mxu0 %vm273_vm1, %v1889_v5 }
   0xf   :  { %1749 = vmatprep.mubr.msk.bf16.mxu0 %vm273_vm1, %v1890_v6 }
  0x16   :  { %1750 = vmatmul.mubr.msk.bf16.gmra.mxu0 %vm273_vm1, %v1891_v7 }
  0x17   :  { %1753 = vmatprep.mubr.msk.bf16.mxu0 %vm273_vm1, %v1892_v8 }
  0x1e   :  { %1754 = vmatmul.mubr.msk.bf16.gmra.mxu0 %vm273_vm1, %v1893_v9 }
  0x1f   :  { %1757 = vmatprep.mubr.msk.bf16.mxu0 %vm273_vm1, %v1894_v10 }
  0x20   :  { %10 = vsyncpa [#allocation3], 0  ;;  %1810 = vmatpush3.bf16.msra.mxu1 %v1920_v13  ;;  %v1897_v14 = vld [vmem:[%s2329_s0 + $0x48] sm:$0xff]   ;;  %v1898_v15 = vld [vmem:[%s2329_s0 + $0x50] sm:$0xff]   ;;  %vm798_vm2 = vcmask 523264   ;;  %vm1504_vm3 = vcmask 1041409  }
  0x21   :  { %v1899_v16 = vld [vmem:[%s2329_s0 + $0x58] sm:$0xff]   ;;  %v1900_v17 = vld [vmem:[%s2329_s0 + $0x60] sm:$0xff]   ;;  %v1901_v18 = vld [vmem:[%s2329_s0 + $0x68] sm:$0xff]   ;;  %vm1506_vm4 = vcmask 1042434   ;;  %vm1508_vm5 = vcmask 1043459   ;;  %vm1510_vm6 = vcmask 1044484  }
  0x22   :  { %v1902_v19 = vld [vmem:[%s2329_s0 + $0x70] sm:$0xff]   ;;  %v1903_v20 = vld [vmem:[%s2329_s0 + $0x78] sm:$0xff]   ;;  %v1904_v21 = vld [vmem:[%s2329_s0 + $0x80] sm:$0xff]   ;;  %vm1512_vm7 = vcmask 1045509   ;;  %vm1514_vm8 = vcmask 1046534   ;;  %vm1516_vm9 = vcmask 1047559  }
  0x23   :  { %v1905_v22 = vld [vmem:[%s2329_s0 + $0x88] sm:$0xff]   ;;  %v1906_v23 = vld [vmem:[%s2329_s0 + $0x90] sm:$0xff]   ;;  %v1907_v25 = vld [vmem:[%s2329_s0 + $0x98] sm:$0xff]  }
  0x24   :  { %v1921_v24 = vld [vmem:[%s2332_s3 + $0x10] sm:$0xff]   ;;  %v1922_v26 = vld [vmem:[%s2332_s3 + $0x8] sm:$0xff]   ;;  %v1908_v27 = vld [vmem:[%s2329_s0 + $0xa0] sm:$0xff]  }
  0x25   :  { %1811 = vmatprep.subr.bf16.mxu1 %v1921_v24  ;;  %v1923_v28 = vld [vmem:[%s2332_s3] sm:$0xff]   ;;  %v1909_v29 = vld [vmem:[%s2329_s0 + $0xa8] sm:$0xff]   ;;  %v1910_v30 = vld [vmem:[%s2329_s0 + $0xb0] sm:$0xff]  }
  0x26   :  { %1758 = vmatmul.mubr.msk.bf16.gmra.mxu0 %vm273_vm1, %v1895_v11  ;;  %1812 = vmatpush3.bf16.msra.mxu1 %v1921_v24  ;;  %v1911_v31 = vld [vmem:[%s2329_s0 + $0xb8] sm:$0xff]   ;;  %v1912_v32 = vld [vmem:[%s2329_s0 + $0xc0] sm:$0xff]   ;;  %v1913_v33 = vld [vmem:[%s2329_s0 + $0xc8] sm:$0xff]  }
  0x27   :  { %1761 = vmatprep.mubr.msk.bf16.mxu0 %vm273_vm1, %v1896_v12  ;;  %1813 = vmatprep.subr.bf16.mxu1 %v1922_v26  ;;  %v1914_v34 = vld [vmem:[%s2329_s0 + $0xd0] sm:$0xff]   ;;  %v1915_v35 = vld [vmem:[%s2329_s0 + $0xd8] sm:$0xff]   ;;  %v1916_v36 = vld [vmem:[%s2329_s0 + $0xe0] sm:$0xff]  }
  0x28   :  { %v1917_v37 = vld [vmem:[%s2329_s0 + $0xe8] sm:$0xff]   ;;  %v1918_v38 = vld [vmem:[%s2329_s0 + $0xf0] sm:$0xff]   ;;  %v1919_v39 = vld [vmem:[%s2329_s0 + $0xf8] sm:$0xff]  }
  0x29   :  { %v2131_v42 = vld [vmem:[%s2331_s2] ss:$0 sm:$0xff] }
  0x2a   :  { %1814 = vmatpush3.bf16.msra.mxu1 %v1922_v26 }
  0x2b   :  { %1815 = vmatprep.subr.bf16.mxu1 %v1923_v28 }
  0x2e   :  { %1762 = vmatmul.mubr.msk.bf16.gmra.mxu0 %vm273_vm1, %v1897_v14  ;;  %1816 = vmatpush3.bf16.msra.mxu1 %v1923_v28 }
  0x2f   :  { %1765 = vmatprep.mubr.msk.bf16.mxu0 %vm273_vm1, %v1898_v15 }
  0x36   :  { %1766 = vmatmul.mubr.msk.bf16.gmra.mxu0 %vm273_vm1, %v1899_v16 }
  0x37   :  { %1769 = vmatprep.mubr.msk.bf16.mxu0 %vm273_vm1, %v1900_v17 }
  0x3e   :  { %1770 = vmatmul.mubr.msk.bf16.gmra.mxu0 %vm273_vm1, %v1901_v18 }
  0x3f   :  { %1773 = vmatprep.mubr.msk.bf16.mxu0 %vm273_vm1, %v1902_v19 }
  0x46   :  { %1774 = vmatmul.mubr.msk.bf16.gmra.mxu0 %vm273_vm1, %v1903_v20 }
  0x47   :  { %1777 = vmatprep.mubr.msk.bf16.mxu0 %vm273_vm1, %v1904_v21 }
  0x4e   :  { %1778 = vmatmul.mubr.msk.bf16.gmra.mxu0 %vm273_vm1, %v1905_v22 }
  0x4f   :  { %1781 = vmatprep.mubr.msk.bf16.mxu0 %vm273_vm1, %v1906_v23 }
  0x56   :  { %1782 = vmatmul.mubr.msk.bf16.gmra.mxu0 %vm273_vm1, %v1907_v25 }
  0x57   :  { %1785 = vmatprep.mubr.msk.bf16.mxu0 %vm273_vm1, %v1908_v27 }
  0x5e   :  { %1786 = vmatmul.mubr.msk.bf16.gmra.mxu0 %vm273_vm1, %v1909_v29 }
  0x5f   :  { %1789 = vmatprep.mubr.msk.bf16.mxu0 %vm273_vm1, %v1910_v30 }
  0x66   :  { %1790 = vmatmul.mubr.msk.bf16.gmra.mxu0 %vm273_vm1, %v1911_v31 }
  0x67   :  { %1793 = vmatprep.mubr.msk.bf16.mxu0 %vm273_vm1, %v1912_v32 }
  0x6e   :  { %1794 = vmatmul.mubr.msk.bf16.gmra.mxu0 %vm273_vm1, %v1913_v33 }
  0x6f   :  { %1797 = vmatprep.mubr.msk.bf16.mxu0 %vm273_vm1, %v1914_v34 }
  0x76   :  { %1798 = vmatmul.mubr.msk.bf16.gmra.mxu0 %vm273_vm1, %v1915_v35 }
  0x77   :  { %1801 = vmatprep.mubr.msk.bf16.mxu0 %vm273_vm1, %v1916_v36 }
  0x7e   :  { %1802 = vmatmul.mubr.msk.bf16.gmra.mxu0 %vm273_vm1, %v1917_v37 }
  0x7f   :  { %1805 = vmatprep.mubr.msk.bf16.mxu0 %vm273_vm1, %v1918_v38 }
  0x86   :  { %1806 = vmatmul.mubr.msk.bf16.gmra.mxu0 %vm273_vm1, %v1919_v39 }
  0xce   :  { %v1747_v40 = vpop.f32.mrf.mxu0 }
  0xcf   :  { %v417_v46 = vadd.f32 %v1747_v40, %v2131_v42 }
  0xd0   :  { %v408_v41 = vpop.f32.mrf.mxu0 }
  0xd1   :  { %v409_v44 = vadd.f32 %v2131_v42, %v408_v41  ;;  %v665_v53 = vmax.f32 %v417_v46, 0.0 }
  0xd2   :  { %v1748_v43 = vpop.f32.mrf.mxu0 }
  0xd3   :  { %v420_v45 = vadd.f32 %v1748_v43, %v2131_v42  ;;  %v663_v51 = vmax.f32 %v409_v44, 0.0 }
  0xd4   :  { %v411_v47 = vpop.f32.mrf.mxu0 }
  0xd5   :  { %v412_v48 = vadd.f32 %v2131_v42, %v411_v47  ;;  %v666_v49 = vmax.f32 %v420_v45, 0.0 }
  0xd6   :  { %v1751_v50 = vpop.f32.mrf.mxu0 }
  0xd7   :  { %v664_v52 = vmax.f32 %v412_v48, 0.0  ;;  %v728_v56 = vpack.c.bf16 %v666_v49, %v665_v53  ;;  %v433_v60 = vadd.f32 %v1751_v50, %v2131_v42 }
  0xd8   :  { %v424_v54 = vpop.f32.mrf.mxu0 }
  0xd9   :  { %v727_v55 = vpack.c.bf16 %v664_v52, %v663_v51  ;;  %v425_v58 = vadd.f32 %v2131_v42, %v424_v54  ;;  %v669_v3 = vmax.f32 %v433_v60, 0.0 }
  0xda   :  { %v1752_v57 = vpop.f32.mrf.mxu0 }
  0xdb   :  { %v436_v59 = vadd.f32 %v1752_v57, %v2131_v42  ;;  %1817 = vmatprep.mubr.msk.bf16.mxu1 %vm798_vm2, %v727_v55  ;;  %v667_v1 = vmax.f32 %v425_v58, 0.0 }
  0xdc   :  { %v427_v61 = vpop.f32.mrf.mxu0  ;;  %1818 = vmatmul.mubr.msk.bf16.vlgmr.msra.gmra.mxu1 %vm798_vm2, %v728_v56 }
  0xdd   :  { %v428_v62 = vadd.f32 %v2131_v42, %v427_v61  ;;  %v670_v63 = vmax.f32 %v436_v59, 0.0 }
  0xde   :  { %v1755_v0 = vpop.f32.mrf.mxu0 }
  0xdf   :  { %v668_v2 = vmax.f32 %v428_v62, 0.0  ;;  %v730_v6 = vpack.c.bf16 %v670_v63, %v669_v3  ;;  %v449_v10 = vadd.f32 %v1755_v0, %v2131_v42 }
  0xe0   :  { %v440_v4 = vpop.f32.mrf.mxu0 }
  0xe1   :  { %v729_v5 = vpack.c.bf16 %v668_v2, %v667_v1  ;;  %v441_v8 = vadd.f32 %v2131_v42, %v440_v4  ;;  %v673_v17 = vmax.f32 %v449_v10, 0.0 }
  0xe2   :  { %v1756_v7 = vpop.f32.mrf.mxu0 }
  0xe3   :  { %v452_v9 = vadd.f32 %v1756_v7, %v2131_v42  ;;  %1821 = vmatprep.mubr.msk.bf16.mxu1 %vm798_vm2, %v729_v5  ;;  %v671_v15 = vmax.f32 %v441_v8, 0.0 }
  0xe4   :  { %v443_v11 = vpop.f32.mrf.mxu0  ;;  %1822 = vmatmul.mubr.msk.bf16.gmra.mxu1 %vm798_vm2, %v730_v6 }
  0xe5   :  { %v444_v12 = vadd.f32 %v2131_v42, %v443_v11  ;;  %v674_v13 = vmax.f32 %v452_v9, 0.0 }
  0xe6   :  { %v1759_v14 = vpop.f32.mrf.mxu0 }
  0xe7   :  { %v672_v16 = vmax.f32 %v444_v12, 0.0  ;;  %v732_v20 = vpack.c.bf16 %v674_v13, %v673_v17  ;;  %v465_v24 = vadd.f32 %v1759_v14, %v2131_v42 }
  0xe8   :  { %v456_v18 = vpop.f32.mrf.mxu0 }
  0xe9   :  { %v731_v19 = vpack.c.bf16 %v672_v16, %v671_v15  ;;  %v457_v22 = vadd.f32 %v2131_v42, %v456_v18  ;;  %v677_v31 = vmax.f32 %v465_v24, 0.0 }
  0xea   :  { %v1760_v21 = vpop.f32.mrf.mxu0 }
  0xeb   :  { %v468_v23 = vadd.f32 %v1760_v21, %v2131_v42  ;;  %1825 = vmatprep.mubr.msk.bf16.mxu1 %vm798_vm2, %v731_v19  ;;  %v675_v29 = vmax.f32 %v457_v22, 0.0 }
  0xec   :  { %v459_v25 = vpop.f32.mrf.mxu0  ;;  %1826 = vmatmul.mubr.msk.bf16.gmra.mxu1 %vm798_vm2, %v732_v20 }
  0xed   :  { %v460_v26 = vadd.f32 %v2131_v42, %v459_v25  ;;  %v678_v27 = vmax.f32 %v468_v23, 0.0 }
  0xee   :  { %v1763_v28 = vpop.f32.mrf.mxu0 }
  0xef   :  { %v676_v30 = vmax.f32 %v460_v26, 0.0  ;;  %v734_v34 = vpack.c.bf16 %v678_v27, %v677_v31  ;;  %v481_v38 = vadd.f32 %v1763_v28, %v2131_v42 }
  0xf0   :  { %v472_v32 = vpop.f32.mrf.mxu0 }
  0xf1   :  { %v733_v33 = vpack.c.bf16 %v676_v30, %v675_v29  ;;  %v473_v36 = vadd.f32 %v2131_v42, %v472_v32  ;;  %v681_v46 = vmax.f32 %v481_v38, 0.0 }
  0xf2   :  { %v1764_v35 = vpop.f32.mrf.mxu0 }
  0xf3   :  { %v484_v37 = vadd.f32 %v1764_v35, %v2131_v42  ;;  %1829 = vmatprep.mubr.msk.bf16.mxu1 %vm798_vm2, %v733_v33  ;;  %v679_v44 = vmax.f32 %v473_v36, 0.0 }
  0xf4   :  { %v475_v39 = vpop.f32.mrf.mxu0  ;;  %1830 = vmatmul.mubr.msk.bf16.gmra.mxu1 %vm798_vm2, %v734_v34 }
  0xf5   :  { %v476_v40 = vadd.f32 %v2131_v42, %v475_v39  ;;  %v682_v41 = vmax.f32 %v484_v37, 0.0 }
  0xf6   :  { %v1767_v43 = vpop.f32.mrf.mxu0 }
  0xf7   :  { %v680_v45 = vmax.f32 %v476_v40, 0.0  ;;  %v736_v49 = vpack.c.bf16 %v682_v41, %v681_v46  ;;  %v497_v53 = vadd.f32 %v1767_v43, %v2131_v42 }
  0xf8   :  { %v488_v47 = vpop.f32.mrf.mxu0 }
  0xf9   :  { %v735_v48 = vpack.c.bf16 %v680_v45, %v679_v44  ;;  %v489_v51 = vadd.f32 %v2131_v42, %v488_v47  ;;  %v685_v60 = vmax.f32 %v497_v53, 0.0 }
  0xfa   :  { %v1768_v50 = vpop.f32.mrf.mxu0 }
  0xfb   :  { %v500_v52 = vadd.f32 %v1768_v50, %v2131_v42  ;;  %1833 = vmatprep.mubr.msk.bf16.mxu1 %vm798_vm2, %v735_v48  ;;  %v683_v58 = vmax.f32 %v489_v51, 0.0 }
  0xfc   :  { %v491_v54 = vpop.f32.mrf.mxu0  ;;  %1834 = vmatmul.mubr.msk.bf16.gmra.mxu1 %vm798_vm2, %v736_v49 }
  0xfd   :  { %v492_v55 = vadd.f32 %v2131_v42, %v491_v54  ;;  %v686_v56 = vmax.f32 %v500_v52, 0.0 }
  0xfe   :  { %v1771_v57 = vpop.f32.mrf.mxu0 }
  0xff   :  { %v684_v59 = vmax.f32 %v492_v55, 0.0  ;;  %v738_v63 = vpack.c.bf16 %v686_v56, %v685_v60  ;;  %v513_v3 = vadd.f32 %v1771_v57, %v2131_v42 }
 0x100   :  { %v504_v61 = vpop.f32.mrf.mxu0 }
 0x101   :  { %v737_v62 = vpack.c.bf16 %v684_v59, %v683_v58  ;;  %v505_v1 = vadd.f32 %v2131_v42, %v504_v61  ;;  %v689_v10 = vmax.f32 %v513_v3, 0.0 }
 0x102   :  { %v1772_v0 = vpop.f32.mrf.mxu0 }
 0x103   :  { %v516_v2 = vadd.f32 %v1772_v0, %v2131_v42  ;;  %1837 = vmatprep.mubr.msk.bf16.mxu1 %vm798_vm2, %v737_v62  ;;  %v687_v8 = vmax.f32 %v505_v1, 0.0 }
 0x104   :  { %v507_v4 = vpop.f32.mrf.mxu0  ;;  %1838 = vmatmul.mubr.msk.bf16.gmra.mxu1 %vm798_vm2, %v738_v63 }
 0x105   :  { %v508_v5 = vadd.f32 %v2131_v42, %v507_v4  ;;  %v690_v6 = vmax.f32 %v516_v2, 0.0 }
 0x106   :  { %v1775_v7 = vpop.f32.mrf.mxu0 }
 0x107   :  { %v688_v9 = vmax.f32 %v508_v5, 0.0  ;;  %v740_v13 = vpack.c.bf16 %v690_v6, %v689_v10  ;;  %v529_v17 = vadd.f32 %v1775_v7, %v2131_v42 }
 0x108   :  { %v520_v11 = vpop.f32.mrf.mxu0 }
 0x109   :  { %v739_v12 = vpack.c.bf16 %v688_v9, %v687_v8  ;;  %v521_v15 = vadd.f32 %v2131_v42, %v520_v11  ;;  %v693_v24 = vmax.f32 %v529_v17, 0.0 }
 0x10a   :  { %v1776_v14 = vpop.f32.mrf.mxu0 }
 0x10b   :  { %v532_v16 = vadd.f32 %v1776_v14, %v2131_v42  ;;  %1841 = vmatprep.mubr.msk.bf16.mxu1 %vm798_vm2, %v739_v12  ;;  %v691_v22 = vmax.f32 %v521_v15, 0.0 }
 0x10c   :  { %v523_v18 = vpop.f32.mrf.mxu0  ;;  %1842 = vmatmul.mubr.msk.bf16.gmra.mxu1 %vm798_vm2, %v740_v13 }
 0x10d   :  { %v524_v19 = vadd.f32 %v2131_v42, %v523_v18  ;;  %v694_v20 = vmax.f32 %v532_v16, 0.0 }
 0x10e   :  { %v1779_v21 = vpop.f32.mrf.mxu0 }
 0x10f   :  { %v692_v23 = vmax.f32 %v524_v19, 0.0  ;;  %v742_v27 = vpack.c.bf16 %v694_v20, %v693_v24  ;;  %v545_v31 = vadd.f32 %v1779_v21, %v2131_v42 }
 0x110   :  { %v536_v25 = vpop.f32.mrf.mxu0 }
 0x111   :  { %v741_v26 = vpack.c.bf16 %v692_v23, %v691_v22  ;;  %v537_v29 = vadd.f32 %v2131_v42, %v536_v25  ;;  %v697_v38 = vmax.f32 %v545_v31, 0.0 }
 0x112   :  { %v1780_v28 = vpop.f32.mrf.mxu0 }
 0x113   :  { %v548_v30 = vadd.f32 %v1780_v28, %v2131_v42  ;;  %1845 = vmatprep.mubr.msk.bf16.mxu1 %vm798_vm2, %v741_v26  ;;  %v695_v36 = vmax.f32 %v537_v29, 0.0 }
 0x114   :  { %v539_v32 = vpop.f32.mrf.mxu0  ;;  %1846 = vmatmul.mubr.msk.bf16.gmra.mxu1 %vm798_vm2, %v742_v27 }
 0x115   :  { %v540_v33 = vadd.f32 %v2131_v42, %v539_v32  ;;  %v698_v34 = vmax.f32 %v548_v30, 0.0 }
 0x116   :  { %v1783_v35 = vpop.f32.mrf.mxu0 }
 0x117   :  { %v696_v37 = vmax.f32 %v540_v33, 0.0  ;;  %v744_v41 = vpack.c.bf16 %v698_v34, %v697_v38  ;;  %v561_v46 = vadd.f32 %v1783_v35, %v2131_v42 }
 0x118   :  { %v552_v39 = vpop.f32.mrf.mxu0 }
 0x119   :  { %v743_v40 = vpack.c.bf16 %v696_v37, %v695_v36  ;;  %v553_v44 = vadd.f32 %v2131_v42, %v552_v39  ;;  %v701_v53 = vmax.f32 %v561_v46, 0.0 }
 0x11a   :  { %v1784_v43 = vpop.f32.mrf.mxu0 }
 0x11b   :  { %v564_v45 = vadd.f32 %v1784_v43, %v2131_v42  ;;  %1849 = vmatprep.mubr.msk.bf16.mxu1 %vm798_vm2, %v743_v40  ;;  %v699_v51 = vmax.f32 %v553_v44, 0.0 }
 0x11c   :  { %v555_v47 = vpop.f32.mrf.mxu0  ;;  %1850 = vmatmul.mubr.msk.bf16.gmra.mxu1 %vm798_vm2, %v744_v41 }
 0x11d   :  { %v556_v48 = vadd.f32 %v2131_v42, %v555_v47  ;;  %v702_v49 = vmax.f32 %v564_v45, 0.0 }
 0x11e   :  { %v1787_v50 = vpop.f32.mrf.mxu0 }
 0x11f   :  { %v700_v52 = vmax.f32 %v556_v48, 0.0  ;;  %v746_v56 = vpack.c.bf16 %v702_v49, %v701_v53  ;;  %v577_v60 = vadd.f32 %v1787_v50, %v2131_v42 }
 0x120   :  { %v568_v54 = vpop.f32.mrf.mxu0 }
 0x121   :  { %v745_v55 = vpack.c.bf16 %v700_v52, %v699_v51  ;;  %v569_v58 = vadd.f32 %v2131_v42, %v568_v54  ;;  %v705_v3 = vmax.f32 %v577_v60, 0.0 }
 0x122   :  { %v1788_v57 = vpop.f32.mrf.mxu0 }
 0x123   :  { %v580_v59 = vadd.f32 %v1788_v57, %v2131_v42  ;;  %1853 = vmatprep.mubr.msk.bf16.mxu1 %vm798_vm2, %v745_v55  ;;  %v703_v1 = vmax.f32 %v569_v58, 0.0 }
 0x124   :  { %v571_v61 = vpop.f32.mrf.mxu0  ;;  %1854 = vmatmul.mubr.msk.bf16.gmra.mxu1 %vm798_vm2, %v746_v56 }
 0x125   :  { %v572_v62 = vadd.f32 %v2131_v42, %v571_v61  ;;  %v706_v63 = vmax.f32 %v580_v59, 0.0 }
 0x126   :  { %v1791_v0 = vpop.f32.mrf.mxu0 }
 0x127   :  { %v704_v2 = vmax.f32 %v572_v62, 0.0  ;;  %v748_v6 = vpack.c.bf16 %v706_v63, %v705_v3  ;;  %v593_v10 = vadd.f32 %v1791_v0, %v2131_v42 }
 0x128   :  { %v584_v4 = vpop.f32.mrf.mxu0 }
 0x129   :  { %v747_v5 = vpack.c.bf16 %v704_v2, %v703_v1  ;;  %v585_v8 = vadd.f32 %v2131_v42, %v584_v4  ;;  %v709_v17 = vmax.f32 %v593_v10, 0.0 }
 0x12a   :  { %v1792_v7 = vpop.f32.mrf.mxu0 }
 0x12b   :  { %v596_v9 = vadd.f32 %v1792_v7, %v2131_v42  ;;  %1857 = vmatprep.mubr.msk.bf16.mxu1 %vm798_vm2, %v747_v5  ;;  %v707_v15 = vmax.f32 %v585_v8, 0.0 }
 0x12c   :  { %v587_v11 = vpop.f32.mrf.mxu0  ;;  %1858 = vmatmul.mubr.msk.bf16.gmra.mxu1 %vm798_vm2, %v748_v6 }
 0x12d   :  { %v588_v12 = vadd.f32 %v2131_v42, %v587_v11  ;;  %v710_v13 = vmax.f32 %v596_v9, 0.0 }
 0x12e   :  { %v1795_v14 = vpop.f32.mrf.mxu0 }
 0x12f   :  { %v708_v16 = vmax.f32 %v588_v12, 0.0  ;;  %v750_v20 = vpack.c.bf16 %v710_v13, %v709_v17  ;;  %v609_v24 = vadd.f32 %v1795_v14, %v2131_v42  ;;  %v2232_v13 = vld [vmem:[%s2333_s4] ss:$0 sm:$0xff]  ;;  %s1946_s4 = smov [#allocation2]  }
 0x130   :  { %v600_v18 = vpop.f32.mrf.mxu0  ;;  %s1552_s19 = sshll.u32 %s1946_s4, 4  ;;  %s1553_s19 = int_to_ptr.vmem [resolvable:$true] %s1552_s19 }
 0x131   :  { %v749_v19 = vpack.c.bf16 %v708_v16, %v707_v15  ;;  %v601_v22 = vadd.f32 %v2131_v42, %v600_v18  ;;  %v713_v31 = vmax.f32 %v609_v24, 0.0  ;;  %s1924_s20 = scalar_lea.vmem %s1553_s19, 512  ;;  %p1929_p1 = scmp.lt.s32.totalorder %s1553_s19, %s1553_s19 }
 0x132   :  { %v1796_v21 = vpop.f32.mrf.mxu0  ;;  %p1925_p0 = scmp.ne.s32.totalorder %s1553_s19, %s1924_s20  ;;  %p1930_p2 = scmp.lt.s32.totalorder %s1924_s20, %s1924_s20 }
 0x133   :  { %v612_v23 = vadd.f32 %v1796_v21, %v2131_v42  ;;  %1861 = vmatprep.mubr.msk.bf16.mxu1 %vm798_vm2, %v749_v19  ;;  %v711_v29 = vmax.f32 %v601_v22, 0.0 }
 0x134   :  { %v603_v25 = vpop.f32.mrf.mxu0  ;;  %1862 = vmatmul.mubr.msk.bf16.gmra.mxu1 %vm798_vm2, %v750_v20  ;;  %p1931_p3 = por %p1930_p2, %p1929_p1 }
 0x135   :  { %v604_v26 = vadd.f32 %v2131_v42, %v603_v25  ;;  %v714_v27 = vmax.f32 %v612_v23, 0.0 }
 0x136   :  { %v1799_v28 = vpop.f32.mrf.mxu0  ;;  %p1932_p4 = pnand %p1931_p3, %p1925_p0 }
 0x137   :  { %v712_v30 = vmax.f32 %v604_v26, 0.0  ;;  %v752_v34 = vpack.c.bf16 %v714_v27, %v713_v31  ;;  %v625_v38 = vadd.f32 %v1799_v28, %v2131_v42 }
 0x138   :  { %v616_v32 = vpop.f32.mrf.mxu0 }
 0x139   :  { %v751_v33 = vpack.c.bf16 %v712_v30, %v711_v29  ;;  %v617_v36 = vadd.f32 %v2131_v42, %v616_v32  ;;  %v717_v46 = vmax.f32 %v625_v38, 0.0 }
 0x13a   :  { %v1800_v35 = vpop.f32.mrf.mxu0 }
 0x13b   :  { %v628_v37 = vadd.f32 %v1800_v35, %v2131_v42  ;;  %1865 = vmatprep.mubr.msk.bf16.mxu1 %vm798_vm2, %v751_v33  ;;  %v715_v44 = vmax.f32 %v617_v36, 0.0 }
 0x13c   :  { %v619_v39 = vpop.f32.mrf.mxu0  ;;  %1866 = vmatmul.mubr.msk.bf16.gmra.mxu1 %vm798_vm2, %v752_v34 }
 0x13d   :  { %v620_v40 = vadd.f32 %v2131_v42, %v619_v39  ;;  %v718_v41 = vmax.f32 %v628_v37, 0.0 }
 0x13e   :  { %v1803_v43 = vpop.f32.mrf.mxu0 }
 0x13f   :  { %v716_v45 = vmax.f32 %v620_v40, 0.0  ;;  %v754_v49 = vpack.c.bf16 %v718_v41, %v717_v46  ;;  %v641_v53 = vadd.f32 %v1803_v43, %v2131_v42 }
 0x140   :  { %v632_v47 = vpop.f32.mrf.mxu0 }
 0x141   :  { %v753_v48 = vpack.c.bf16 %v716_v45, %v715_v44  ;;  %v633_v51 = vadd.f32 %v2131_v42, %v632_v47  ;;  %v721_v60 = vmax.f32 %v641_v53, 0.0 }
 0x142   :  { %v1804_v50 = vpop.f32.mrf.mxu0 }
 0x143   :  { %v644_v52 = vadd.f32 %v1804_v50, %v2131_v42  ;;  %1869 = vmatprep.mubr.msk.bf16.mxu1 %vm798_vm2, %v753_v48  ;;  %v719_v58 = vmax.f32 %v633_v51, 0.0 }
 0x144   :  { %v635_v54 = vpop.f32.mrf.mxu0  ;;  %1870 = vmatmul.mubr.msk.bf16.gmra.mxu1 %vm798_vm2, %v754_v49 }
 0x145   :  { %v636_v55 = vadd.f32 %v2131_v42, %v635_v54  ;;  %v722_v56 = vmax.f32 %v644_v52, 0.0 }
 0x146   :  { %v1807_v57 = vpop.f32.mrf.mxu0 }
 0x147   :  { %v720_v59 = vmax.f32 %v636_v55, 0.0  ;;  %v756_v63 = vpack.c.bf16 %v722_v56, %v721_v60  ;;  %v657_v3 = vadd.f32 %v1807_v57, %v2131_v42 }
 0x148   :  { %v648_v61 = vpop.f32.mrf.mxu0 }
 0x149   :  { %v755_v62 = vpack.c.bf16 %v720_v59, %v719_v58  ;;  %v649_v1 = vadd.f32 %v2131_v42, %v648_v61  ;;  %v725_v9 = vmax.f32 %v657_v3, 0.0 }
 0x14a   :  { %v1808_v0 = vpop.f32.mrf.mxu0 }
 0x14b   :  { %v660_v2 = vadd.f32 %v1808_v0, %v2131_v42  ;;  %1873 = vmatprep.mubr.msk.bf16.mxu1 %vm798_vm2, %v755_v62  ;;  %v723_v7 = vmax.f32 %v649_v1, 0.0 }
 0x14c   :  { %v651_v4 = vpop.f32.mrf.mxu0  ;;  %1874 = vmatmul.mubr.msk.bf16.gmra.mxu1 %vm798_vm2, %v756_v63 }
 0x14d   :  { %v652_v5 = vadd.f32 %v2131_v42, %v651_v4  ;;  %v726_v6 = vmax.f32 %v660_v2, 0.0 }
 0x14f   :  { %v724_v8 = vmax.f32 %v652_v5, 0.0  ;;  %v758_v11 = vpack.c.bf16 %v726_v6, %v725_v9 }
 0x151   :  { %v757_v10 = vpack.c.bf16 %v724_v8, %v723_v7 }
 0x153   :  { %1877 = vmatprep.mubr.msk.bf16.mxu1 %vm798_vm2, %v757_v10 }
 0x154   :  { %1878 = vmatmul.mubr.msk.bf16.gmra.mxu1 %vm798_vm2, %v758_v11 }
 0x19c   :  { %v1819_v12 = vpop.f32.mrf.mxu1 }
 0x19d   :  { %v938_v15 = vadd.f32 %v1819_v12, %v2232_v13 }
 0x19e   :  { %v929_v14 = vpop.f32.mrf.mxu1 }
 0x19f   :  { %v930_v16 = vadd.f32 %v2232_v13, %v929_v14  ;;  %v1186_v21 = vmax.f32 %v938_v15, 0.0 }
 0x1a0   :  { %v1820_v42 = vpop.f32.mrf.mxu1 }
 0x1a1   :  { %v941_v17 = vadd.f32 %v1820_v42, %v2232_v13  ;;  %v1184_v23 = vmax.f32 %v930_v16, 0.0 }
 0x1a2   :  { %v932_v18 = vpop.f32.mrf.mxu1 }
 0x1a3   :  { %v1187_v19 = vmax.f32 %v941_v17, 0.0  ;;  %v933_v20 = vadd.f32 %v2232_v13, %v932_v18 }
 0x1a4   :  { %v1823_v22 = vpop.f32.mrf.mxu1 }
 0x1a5   :  { %v1185_v24 = vmax.f32 %v933_v20, 0.0  ;;  %v1255_v25 = vmax.f32 %v1186_v21, %v1187_v19  ;;  %v954_v28 = vadd.f32 %v1823_v22, %v2232_v13 }
 0x1a6   :  { %v945_v26 = vpop.f32.mrf.mxu1 }
 0x1a7   :  { %v1248_v27 = vmax.f32 %v1184_v23, %v1185_v24  ;;  %v946_v30 = vadd.f32 %v2232_v13, %v945_v26  ;;  %v1256_v32 = vrot.slane %v1255_v25, 4  ;;  %v1190_v35 = vmax.f32 %v954_v28, 0.0 }
 0x1a8   :  { %v1824_v29 = vpop.f32.mrf.mxu1 }
 0x1a9   :  { %v957_v31 = vadd.f32 %v1824_v29, %v2232_v13  ;;  %v1249_v34 = vrot.slane %v1248_v27, 4  ;;  %v1188_v39 = vmax.f32 %v946_v30, 0.0  ;;  %v1257_v43 = vmax.f32 %v1255_v25, %v1256_v32 }
 0x1aa   :  { %v948_v33 = vpop.f32.mrf.mxu1 }
 0x1ab   :  { %v1191_v36 = vmax.f32 %v957_v31, 0.0  ;;  %v949_v37 = vadd.f32 %v2232_v13, %v948_v33  ;;  %v1250_v45 = vmax.f32 %v1248_v27, %v1249_v34  ;;  %v1258_v52 = vrot.slane %v1257_v43, 2 }
 0x1ac   :  { %v1827_v38 = vpop.f32.mrf.mxu1 }
 0x1ad   :  { %v1269_v40 = vmax.f32 %v1190_v35, %v1191_v36  ;;  %v1189_v41 = vmax.f32 %v949_v37, 0.0  ;;  %v970_v48 = vadd.f32 %v1827_v38, %v2232_v13  ;;  %v1251_v55 = vrot.slane %v1250_v45, 2 }
 0x1ae   :  { %v961_v44 = vpop.f32.mrf.mxu1  ;;  %v1259_v1 = vmax.f32 %v1257_v43, %v1258_v52 }
 0x1af   :  { %v1270_v46 = vrot.slane %v1269_v40, 4  ;;  %v1262_v47 = vmax.f32 %v1188_v39, %v1189_v41  ;;  %v962_v51 = vadd.f32 %v2232_v13, %v961_v44  ;;  %v1194_v59 = vmax.f32 %v970_v48, 0.0 }
 0x1b0   :  { %v1828_v49 = vpop.f32.mrf.mxu1  ;;  %v1252_v4 = vmax.f32 %v1250_v45, %v1251_v55  ;;  %v1260_v14 = vrot.slane %v1259_v1, 1 }
 0x1b1   :  { %v1263_v50 = vrot.slane %v1262_v47, 4  ;;  %v973_v53 = vadd.f32 %v1828_v49, %v2232_v13  ;;  %v1271_v56 = vmax.f32 %v1269_v40, %v1270_v46  ;;  %v1192_v63 = vmax.f32 %v962_v51, 0.0 }
 0x1b2   :  { %v964_v54 = vpop.f32.mrf.mxu1  ;;  %v1253_v17 = vrot.slane %v1252_v4, 1  ;;  %v1261_v35 = vmax.f32 %v1259_v1, %v1260_v14 }
 0x1b3   :  { %v1264_v57 = vmax.f32 %v1262_v47, %v1263_v50  ;;  %v965_v58 = vadd.f32 %v2232_v13, %v964_v54  ;;  %v1195_v60 = vmax.f32 %v973_v53, 0.0  ;;  %v1272_v5 = vrot.slane %v1271_v56, 2 }
 0x1b4   :  { %v1831_v61 = vpop.f32.mrf.mxu1  ;;  %v1254_v31 = vmax.f32 %v1252_v4, %v1253_v17 }
 0x1b5   :  { %v1265_v62 = vrot.slane %v1264_v57, 2  ;;  %v1193_v0 = vmax.f32 %v965_v58, 0.0  ;;  %v1283_v2 = vmax.f32 %v1194_v59, %v1195_v60  ;;  %v986_v9 = vadd.f32 %v1831_v61, %v2232_v13 }
 0x1b6   :  { %v977_v3 = vpop.f32.mrf.mxu1  ;;  %v1273_v18 = vmax.f32 %v1271_v56, %v1272_v5  ;;  %v1505_v48 = vsel %vm1504_vm3, %v1261_v35, %v1254_v31 }
 0x1b7   :  { %v1276_v6 = vmax.f32 %v1192_v63, %v1193_v0  ;;  %v1266_v7 = vmax.f32 %v1264_v57, %v1265_v62  ;;  %v1284_v8 = vrot.slane %v1283_v2, 4  ;;  %v978_v12 = vadd.f32 %v2232_v13, %v977_v3 }
 0x1b8   :  { %v1832_v10 = vpop.f32.mrf.mxu1  ;;  %v1198_v23 = vmax.f32 %v986_v9, 0.0  ;;  %v1274_v32 = vrot.slane %v1273_v18, 1 }
 0x1b9   :  { %v1277_v11 = vrot.slane %v1276_v6, 4  ;;  %v1285_v15 = vmax.f32 %v1283_v2, %v1284_v8  ;;  %v989_v42 = vadd.f32 %v1832_v10, %v2232_v13  ;;  %v1267_v21 = vrot.slane %v1266_v7, 1 }
 0x1ba   :  { %v980_v16 = vpop.f32.mrf.mxu1  ;;  %v1196_v27 = vmax.f32 %v978_v12, 0.0  ;;  %v1275_v49 = vmax.f32 %v1273_v18, %v1274_v32 }
 0x1bb   :  { %v1278_v19 = vmax.f32 %v1276_v6, %v1277_v11  ;;  %v981_v20 = vadd.f32 %v2232_v13, %v980_v16  ;;  %v1286_v22 = vrot.slane %v1285_v15, 2  ;;  %v1199_v24 = vmax.f32 %v989_v42, 0.0 }
 0x1bc   :  { %v1835_v25 = vpop.f32.mrf.mxu1  ;;  %v1268_v36 = vmax.f32 %v1266_v7, %v1267_v21 }
 0x1bd   :  { %v1279_v26 = vrot.slane %v1278_v19, 2  ;;  %v1197_v28 = vmax.f32 %v981_v20, 0.0  ;;  %v1297_v29 = vmax.f32 %v1198_v23, %v1199_v24  ;;  %v1287_v37 = vmax.f32 %v1285_v15, %v1286_v22 }
 0x1be   :  { %v993_v30 = vpop.f32.mrf.mxu1  ;;  %v1002_v46 = vadd.f32 %v1835_v25, %v2232_v13  ;;  %v1507_v52 = vsel %vm1506_vm4, %v1268_v36, %v1505_v48 }
 0x1bf   :  { %v1280_v33 = vmax.f32 %v1278_v19, %v1279_v26  ;;  %v1290_v34 = vmax.f32 %v1196_v27, %v1197_v28  ;;  %v1298_v38 = vrot.slane %v1297_v29, 4  ;;  %v994_v43 = vadd.f32 %v2232_v13, %v993_v30 }
 0x1c0   :  { %v1836_v39 = vpop.f32.mrf.mxu1  ;;  %v1288_v57 = vrot.slane %v1287_v37, 1  ;;  %v1202_v62 = vmax.f32 %v1002_v46, 0.0  ;;  %v1509_v0 = vsel %vm1508_vm5, %v1275_v49, %v1507_v52 }
 0x1c1   :  { %v1281_v40 = vrot.slane %v1280_v33, 1  ;;  %v1291_v41 = vrot.slane %v1290_v34, 4  ;;  %v1005_v44 = vadd.f32 %v1836_v39, %v2232_v13  ;;  %v1299_v45 = vmax.f32 %v1297_v29, %v1298_v38 }
 0x1c2   :  { %v996_v47 = vpop.f32.mrf.mxu1  ;;  %v1200_v59 = vmax.f32 %v994_v43, 0.0  ;;  %v1289_v8 = vmax.f32 %v1287_v37, %v1288_v57 }
 0x1c3   :  { %v1292_v50 = vmax.f32 %v1290_v34, %v1291_v41  ;;  %v997_v51 = vadd.f32 %v2232_v13, %v996_v47  ;;  %v1282_v53 = vmax.f32 %v1280_v33, %v1281_v40  ;;  %v1300_v54 = vrot.slane %v1299_v45, 2 }
 0x1c4   :  { %v1203_v55 = vmax.f32 %v1005_v44, 0.0  ;;  %v1839_v56 = vpop.f32.mrf.mxu1 }
 0x1c5   :  { %v1293_v58 = vrot.slane %v1292_v50, 2  ;;  %v1201_v60 = vmax.f32 %v997_v51, 0.0  ;;  %v1301_v61 = vmax.f32 %v1299_v45, %v1300_v54  ;;  %v1511_v3 = vsel %vm1510_vm6, %v1282_v53, %v1509_v0 }
 0x1c6   :  { %v1009_v63 = vpop.f32.mrf.mxu1  ;;  %v1311_v5 = vmax.f32 %v1202_v62, %v1203_v55  ;;  %v1018_v6 = vadd.f32 %v1839_v56, %v2232_v13  ;;  %v1513_v42 = vsel %vm1512_vm7, %v1289_v8, %v1511_v3 }
 0x1c7   :  { %v1294_v1 = vmax.f32 %v1292_v50, %v1293_v58  ;;  %v1304_v2 = vmax.f32 %v1200_v59, %v1201_v60  ;;  %v1302_v4 = vrot.slane %v1301_v61, 1  ;;  %v1010_v10 = vadd.f32 %v2232_v13, %v1009_v63 }
 0x1c8   :  { %v1840_v7 = vpop.f32.mrf.mxu1  ;;  %v1312_v18 = vrot.slane %v1311_v5, 4  ;;  %v1206_v19 = vmax.f32 %v1018_v6, 0.0 }
 0x1c9   :  { %v1295_v9 = vrot.slane %v1294_v1, 1  ;;  %v1305_v11 = vrot.slane %v1304_v2, 4  ;;  %v1021_v12 = vadd.f32 %v1840_v7, %v2232_v13  ;;  %v1303_v17 = vmax.f32 %v1301_v61, %v1302_v4 }
 0x1ca   :  { %v1012_v14 = vpop.f32.mrf.mxu1  ;;  %v1204_v23 = vmax.f32 %v1010_v10, 0.0  ;;  %v1313_v30 = vmax.f32 %v1311_v5, %v1312_v18 }
 0x1cb   :  { %v1296_v15 = vmax.f32 %v1294_v1, %v1295_v9  ;;  %v1013_v16 = vadd.f32 %v2232_v13, %v1012_v14  ;;  %v1207_v20 = vmax.f32 %v1021_v12, 0.0  ;;  %v1306_v25 = vmax.f32 %v1304_v2, %v1305_v11 }
 0x1cc   :  { %v1843_v21 = vpop.f32.mrf.mxu1  ;;  %v1314_v43 = vrot.slane %v1313_v30, 2 }
 0x1cd   :  { %v1515_v22 = vsel %vm1514_vm8, %v1296_v15, %v1513_v42  ;;  %v1205_v24 = vmax.f32 %v1013_v16, 0.0  ;;  %v1325_v26 = vmax.f32 %v1206_v19, %v1207_v20  ;;  %v1034_v32 = vadd.f32 %v1843_v21, %v2232_v13 }
 0x1ce   :  { %v1025_v27 = vpop.f32.mrf.mxu1  ;;  %v1517_v28 = vsel %vm1516_vm9, %v1303_v17, %v1515_v22  ;;  %v1307_v36 = vrot.slane %v1306_v25, 2  ;;  %v1315_v56 = vmax.f32 %v1313_v30, %v1314_v43 }
 0x1cf   :  { %v1318_v29 = vmax.f32 %v1204_v23, %v1205_v24  ;;  %1543 = vst [vmem:[#allocation2] sm:$0xff] %v1517_v28  ;;  %v1326_v31 = vrot.slane %v1325_v26, 4  ;;  %v1026_v35 = vadd.f32 %v2232_v13, %v1025_v27  ;;  %v1210_v44 = vmax.f32 %v1034_v32, 0.0 }
 0x1d0   :  { %v1844_v33 = vpop.f32.mrf.mxu1  ;;  %v1308_v50 = vmax.f32 %v1306_v25, %v1307_v36  ;;  %v1316_v7 = vrot.slane %v1315_v56, 1 }
 0x1d1   :  { %v1319_v34 = vrot.slane %v1318_v29, 4  ;;  %v1327_v37 = vmax.f32 %v1325_v26, %v1326_v31  ;;  %v1037_v38 = vadd.f32 %v1844_v33, %v2232_v13  ;;  %v1208_v48 = vmax.f32 %v1026_v35, 0.0 }
 0x1d2   :  { %v1028_v39 = vpop.f32.mrf.mxu1  ;;  %v1309_v63 = vrot.slane %v1308_v50, 1  ;;  %v1317_v21 = vmax.f32 %v1315_v56, %v1316_v7 }
 0x1d3   :  { %v1320_v40 = vmax.f32 %v1318_v29, %v1319_v34  ;;  %v1029_v41 = vadd.f32 %v2232_v13, %v1028_v39  ;;  %v1211_v45 = vmax.f32 %v1037_v38, 0.0  ;;  %v1328_v51 = vrot.slane %v1327_v37, 2 }
 0x1d4   :  { %v1847_v46 = vpop.f32.mrf.mxu1  ;;  %v1310_v42 = vmax.f32 %v1308_v50, %v1309_v63 }
 0x1d5   :  { %v1321_v47 = vrot.slane %v1320_v40, 2  ;;  %v1209_v49 = vmax.f32 %v1029_v41, 0.0  ;;  %v1339_v52 = vmax.f32 %v1210_v44, %v1211_v45  ;;  %v1050_v55 = vadd.f32 %v1847_v46, %v2232_v13 }
 0x1d6   :  { %v1041_v53 = vpop.f32.mrf.mxu1  ;;  %v1329_v0 = vmax.f32 %v1327_v37, %v1328_v51  ;;  %v1518_v29 = vsel %vm1504_vm3, %v1317_v21, %v1310_v42 }
 0x1d7   :  { %v1332_v54 = vmax.f32 %v1208_v48, %v1209_v49  ;;  %v1322_v57 = vmax.f32 %v1320_v40, %v1321_v47  ;;  %v1340_v58 = vrot.slane %v1339_v52, 4  ;;  %v1042_v61 = vadd.f32 %v2232_v13, %v1041_v53 }
 0x1d8   :  { %v1848_v59 = vpop.f32.mrf.mxu1  ;;  %v1214_v4 = vmax.f32 %v1050_v55, 0.0  ;;  %v1330_v17 = vrot.slane %v1329_v0, 1 }
 0x1d9   :  { %v1333_v60 = vrot.slane %v1332_v54, 4  ;;  %v1053_v62 = vadd.f32 %v1848_v59, %v2232_v13  ;;  %v1341_v1 = vmax.f32 %v1339_v52, %v1340_v58  ;;  %v1323_v8 = vrot.slane %v1322_v57, 1 }
 0x1da   :  { %v1044_v2 = vpop.f32.mrf.mxu1  ;;  %v1212_v12 = vmax.f32 %v1042_v61, 0.0  ;;  %v1331_v33 = vmax.f32 %v1329_v0, %v1330_v17 }
 0x1db   :  { %v1334_v3 = vmax.f32 %v1332_v54, %v1333_v60  ;;  %v1215_v5 = vmax.f32 %v1053_v62, 0.0  ;;  %v1045_v6 = vadd.f32 %v2232_v13, %v1044_v2  ;;  %v1342_v9 = vrot.slane %v1341_v1, 2 }
 0x1dc   :  { %v1851_v10 = vpop.f32.mrf.mxu1  ;;  %v1324_v22 = vmax.f32 %v1322_v57, %v1323_v8 }
 0x1dd   :  { %v1335_v11 = vrot.slane %v1334_v3, 2  ;;  %v1353_v14 = vmax.f32 %v1214_v4, %v1215_v5  ;;  %v1213_v15 = vmax.f32 %v1045_v6, 0.0  ;;  %v1343_v23 = vmax.f32 %v1341_v1, %v1342_v9 }
 0x1de   :  { %v1057_v16 = vpop.f32.mrf.mxu1  ;;  %v1066_v30 = vadd.f32 %v1851_v10, %v2232_v13  ;;  %v1519_v37 = vsel %vm1506_vm4, %v1324_v22, %v1518_v29 }
 0x1df   :  { %v1336_v18 = vmax.f32 %v1334_v3, %v1335_v11  ;;  %v1354_v19 = vrot.slane %v1353_v14, 4  ;;  %v1346_v20 = vmax.f32 %v1212_v12, %v1213_v15  ;;  %v1058_v28 = vadd.f32 %v2232_v13, %v1057_v16 }
 0x1e0   :  { %v1852_v24 = vpop.f32.mrf.mxu1  ;;  %v1344_v38 = vrot.slane %v1343_v23, 1  ;;  %v1218_v47 = vmax.f32 %v1066_v30, 0.0  ;;  %v1520_v49 = vsel %vm1508_vm5, %v1331_v33, %v1519_v37 }
 0x1e1   :  { %v1337_v25 = vrot.slane %v1336_v18, 1  ;;  %v1355_v26 = vmax.f32 %v1353_v14, %v1354_v19  ;;  %v1347_v27 = vrot.slane %v1346_v20, 4  ;;  %v1069_v31 = vadd.f32 %v1852_v24, %v2232_v13 }
 0x1e2   :  { %v1060_v32 = vpop.f32.mrf.mxu1  ;;  %v1216_v45 = vmax.f32 %v1058_v28, 0.0  ;;  %v1345_v57 = vmax.f32 %v1343_v23, %v1344_v38 }
 0x1e3   :  { %v1356_v34 = vrot.slane %v1355_v26, 2  ;;  %v1348_v35 = vmax.f32 %v1346_v20, %v1347_v27  ;;  %v1061_v36 = vadd.f32 %v2232_v13, %v1060_v32  ;;  %v1338_v39 = vmax.f32 %v1336_v18, %v1337_v25 }
 0x1e4   :  { %v1219_v40 = vmax.f32 %v1069_v31, 0.0  ;;  %v1855_v41 = vpop.f32.mrf.mxu1 }
 0x1e5   :  { %v1357_v43 = vmax.f32 %v1355_v26, %v1356_v34  ;;  %v1349_v44 = vrot.slane %v1348_v35, 2  ;;  %v1217_v46 = vmax.f32 %v1061_v36, 0.0  ;;  %v1521_v52 = vsel %vm1510_vm6, %v1338_v39, %v1520_v49 }
 0x1e6   :  { %v1073_v48 = vpop.f32.mrf.mxu1  ;;  %v1367_v54 = vmax.f32 %v1218_v47, %v1219_v40  ;;  %v1082_v55 = vadd.f32 %v1855_v41, %v2232_v13  ;;  %v1522_v0 = vsel %vm1512_vm7, %v1345_v57, %v1521_v52 }
 0x1e7   :  { %v1350_v50 = vmax.f32 %v1348_v35, %v1349_v44  ;;  %v1360_v51 = vmax.f32 %v1216_v45, %v1217_v46  ;;  %v1358_v53 = vrot.slane %v1357_v43, 1  ;;  %v1074_v59 = vadd.f32 %v2232_v13, %v1073_v48 }
 0x1e8   :  { %v1856_v56 = vpop.f32.mrf.mxu1  ;;  %v1368_v3 = vrot.slane %v1367_v54, 4  ;;  %v1222_v4 = vmax.f32 %v1082_v55, 0.0 }
 0x1e9   :  { %v1351_v58 = vrot.slane %v1350_v50, 1  ;;  %v1361_v60 = vrot.slane %v1360_v51, 4  ;;  %v1085_v61 = vadd.f32 %v1856_v56, %v2232_v13  ;;  %v1359_v2 = vmax.f32 %v1357_v43, %v1358_v53 }
 0x1ea   :  { %v1076_v62 = vpop.f32.mrf.mxu1  ;;  %v1220_v8 = vmax.f32 %v1074_v59, 0.0  ;;  %v1369_v16 = vmax.f32 %v1367_v54, %v1368_v3 }
 0x1eb   :  { %v1352_v63 = vmax.f32 %v1350_v50, %v1351_v58  ;;  %v1077_v1 = vadd.f32 %v2232_v13, %v1076_v62  ;;  %v1223_v5 = vmax.f32 %v1085_v61, 0.0  ;;  %v1362_v10 = vmax.f32 %v1360_v51, %v1361_v60 }
 0x1ec   :  { %v1859_v6 = vpop.f32.mrf.mxu1  ;;  %v1370_v28 = vrot.slane %v1369_v16, 2 }
 0x1ed   :  { %v1523_v7 = vsel %vm1514_vm8, %v1352_v63, %v1522_v0  ;;  %v1221_v9 = vmax.f32 %v1077_v1, 0.0  ;;  %v1381_v11 = vmax.f32 %v1222_v4, %v1223_v5  ;;  %v1098_v42 = vadd.f32 %v1859_v6, %v2232_v13 }
 0x1ee   :  { %v1089_v12 = vpop.f32.mrf.mxu1  ;;  %v1524_v14 = vsel %vm1516_vm9, %v1359_v2, %v1523_v7  ;;  %v1363_v22 = vrot.slane %v1362_v10, 2  ;;  %v1371_v39 = vmax.f32 %v1369_v16, %v1370_v28 }
 0x1ef   :  { %v1374_v15 = vmax.f32 %v1220_v8, %v1221_v9  ;;  %1544 = vst [vmem:[#allocation2 + $0x8] sm:$0xff] %v1524_v14  ;;  %v1090_v17 = vadd.f32 %v2232_v13, %v1089_v12  ;;  %v1382_v19 = vrot.slane %v1381_v11, 4  ;;  %v1226_v25 = vmax.f32 %v1098_v42, 0.0 }
 0x1f0   :  { %v1860_v18 = vpop.f32.mrf.mxu1  ;;  %v1364_v36 = vmax.f32 %v1362_v10, %v1363_v22  ;;  %v1372_v53 = vrot.slane %v1371_v39, 1 }
 0x1f1   :  { %v1375_v20 = vrot.slane %v1374_v15, 4  ;;  %v1101_v21 = vadd.f32 %v1860_v18, %v2232_v13  ;;  %v1224_v29 = vmax.f32 %v1090_v17, 0.0  ;;  %v1383_v31 = vmax.f32 %v1381_v11, %v1382_v19 }
 0x1f2   :  { %v1092_v23 = vpop.f32.mrf.mxu1  ;;  %v1365_v50 = vrot.slane %v1364_v36, 1  ;;  %v1373_v7 = vmax.f32 %v1371_v39, %v1372_v53 }
 0x1f3   :  { %v1376_v24 = vmax.f32 %v1374_v15, %v1375_v20  ;;  %v1227_v26 = vmax.f32 %v1101_v21, 0.0  ;;  %v1093_v27 = vadd.f32 %v2232_v13, %v1092_v23  ;;  %v1384_v44 = vrot.slane %v1383_v31, 2 }
 0x1f4   :  { %v1863_v30 = vpop.f32.mrf.mxu1  ;;  %v1366_v1 = vmax.f32 %v1364_v36, %v1365_v50 }
 0x1f5   :  { %v1377_v32 = vrot.slane %v1376_v24, 2  ;;  %v1395_v33 = vmax.f32 %v1226_v25, %v1227_v26  ;;  %v1225_v34 = vmax.f32 %v1093_v27, 0.0  ;;  %v1114_v41 = vadd.f32 %v1863_v30, %v2232_v13 }
 0x1f6   :  { %v1105_v35 = vpop.f32.mrf.mxu1  ;;  %v1385_v58 = vmax.f32 %v1383_v31, %v1384_v44  ;;  %v1525_v16 = vsel %vm1504_vm3, %v1373_v7, %v1366_v1 }
 0x1f7   :  { %v1396_v37 = vrot.slane %v1395_v33, 4  ;;  %v1388_v38 = vmax.f32 %v1224_v29, %v1225_v34  ;;  %v1378_v40 = vmax.f32 %v1376_v24, %v1377_v32  ;;  %v1106_v46 = vadd.f32 %v2232_v13, %v1105_v35 }
 0x1f8   :  { %v1864_v43 = vpop.f32.mrf.mxu1  ;;  %v1230_v55 = vmax.f32 %v1114_v41, 0.0  ;;  %v1386_v8 = vrot.slane %v1385_v58, 1 }
 0x1f9   :  { %v1389_v45 = vrot.slane %v1388_v38, 4  ;;  %v1397_v47 = vmax.f32 %v1395_v33, %v1396_v37  ;;  %v1117_v48 = vadd.f32 %v1864_v43, %v2232_v13  ;;  %v1379_v54 = vrot.slane %v1378_v40, 1 }
 0x1fa   :  { %v1108_v49 = vpop.f32.mrf.mxu1  ;;  %v1228_v60 = vmax.f32 %v1106_v46, 0.0  ;;  %v1387_v23 = vmax.f32 %v1385_v58, %v1386_v8 }
 0x1fb   :  { %v1390_v51 = vmax.f32 %v1388_v38, %v1389_v45  ;;  %v1109_v52 = vadd.f32 %v2232_v13, %v1108_v49  ;;  %v1231_v56 = vmax.f32 %v1117_v48, 0.0  ;;  %v1398_v62 = vrot.slane %v1397_v47, 2 }
 0x1fc   :  { %v1867_v57 = vpop.f32.mrf.mxu1  ;;  %v1380_v4 = vmax.f32 %v1378_v40, %v1379_v54 }
 0x1fd   :  { %v1391_v59 = vrot.slane %v1390_v51, 2  ;;  %v1229_v61 = vmax.f32 %v1109_v52, 0.0  ;;  %v1409_v63 = vmax.f32 %v1230_v55, %v1231_v56  ;;  %v1399_v11 = vmax.f32 %v1397_v47, %v1398_v62 }
 0x1fe   :  { %v1121_v0 = vpop.f32.mrf.mxu1  ;;  %v1526_v19 = vsel %vm1506_vm4, %v1380_v4, %v1525_v16  ;;  %v1130_v21 = vadd.f32 %v1867_v57, %v2232_v13 }
 0x1ff   :  { %v1392_v2 = vmax.f32 %v1390_v51, %v1391_v59  ;;  %v1402_v3 = vmax.f32 %v1228_v60, %v1229_v61  ;;  %v1410_v5 = vrot.slane %v1409_v63, 4  ;;  %v1122_v14 = vadd.f32 %v2232_v13, %v1121_v0 }
 0x200   :  { %v1868_v6 = vpop.f32.mrf.mxu1  ;;  %v1400_v27 = vrot.slane %v1399_v11, 1  ;;  %v1527_v32 = vsel %vm1508_vm5, %v1387_v23, %v1526_v19  ;;  %v1234_v35 = vmax.f32 %v1130_v21, 0.0 }
 0x201   :  { %v1393_v9 = vrot.slane %v1392_v2, 1  ;;  %v1403_v10 = vrot.slane %v1402_v3, 4  ;;  %v1411_v12 = vmax.f32 %v1409_v63, %v1410_v5  ;;  %v1133_v15 = vadd.f32 %v1868_v6, %v2232_v13 }
 0x202   :  { %v1124_v42 = vpop.f32.mrf.mxu1  ;;  %v1232_v29 = vmax.f32 %v1122_v14, 0.0  ;;  %v1401_v44 = vmax.f32 %v1399_v11, %v1400_v27 }
 0x203   :  { %v1404_v17 = vmax.f32 %v1402_v3, %v1403_v10  ;;  %v1125_v18 = vadd.f32 %v2232_v13, %v1124_v42  ;;  %v1412_v20 = vrot.slane %v1411_v12, 2  ;;  %v1394_v24 = vmax.f32 %v1392_v2, %v1393_v9 }
 0x204   :  { %v1871_v22 = vpop.f32.mrf.mxu1  ;;  %v1235_v30 = vmax.f32 %v1133_v15, 0.0 }
 0x205   :  { %v1405_v25 = vrot.slane %v1404_v17, 2  ;;  %v1233_v26 = vmax.f32 %v1125_v18, 0.0  ;;  %v1413_v28 = vmax.f32 %v1411_v12, %v1412_v20  ;;  %v1146_v37 = vadd.f32 %v1871_v22, %v2232_v13 }
 0x206   :  { %v1137_v31 = vpop.f32.mrf.mxu1  ;;  %v1528_v39 = vsel %vm1510_vm6, %v1394_v24, %v1527_v32  ;;  %v1423_v45 = vmax.f32 %v1234_v35, %v1235_v30 }
 0x207   :  { %v1406_v33 = vmax.f32 %v1404_v17, %v1405_v25  ;;  %v1414_v34 = vrot.slane %v1413_v28, 1  ;;  %v1416_v36 = vmax.f32 %v1232_v29, %v1233_v26  ;;  %v1138_v41 = vadd.f32 %v2232_v13, %v1137_v31 }
 0x208   :  { %v1872_v38 = vpop.f32.mrf.mxu1  ;;  %v1529_v51 = vsel %vm1512_vm7, %v1401_v44, %v1528_v39  ;;  %v1238_v53 = vmax.f32 %v1146_v37, 0.0  ;;  %v1424_v58 = vrot.slane %v1423_v45, 4 }
 0x209   :  { %v1407_v40 = vrot.slane %v1406_v33, 1  ;;  %v1149_v43 = vadd.f32 %v1872_v38, %v2232_v13  ;;  %v1415_v50 = vmax.f32 %v1413_v28, %v1414_v34  ;;  %v1417_v52 = vrot.slane %v1416_v36, 4 }
 0x20a   :  { %v1140_v46 = vpop.f32.mrf.mxu1  ;;  %v1236_v56 = vmax.f32 %v1138_v41, 0.0  ;;  %v1425_v4 = vmax.f32 %v1423_v45, %v1424_v58 }
 0x20b   :  { %v1408_v47 = vmax.f32 %v1406_v33, %v1407_v40  ;;  %v1239_v48 = vmax.f32 %v1149_v43, 0.0  ;;  %v1141_v49 = vadd.f32 %v2232_v13, %v1140_v46  ;;  %v1418_v63 = vmax.f32 %v1416_v36, %v1417_v52 }
 0x20c   :  { %v1875_v54 = vpop.f32.mrf.mxu1  ;;  %v1426_v17 = vrot.slane %v1425_v4, 2 }
 0x20d   :  { %v1530_v55 = vsel %vm1514_vm8, %v1408_v47, %v1529_v51  ;;  %v1237_v57 = vmax.f32 %v1141_v49, 0.0  ;;  %v1437_v59 = vmax.f32 %v1238_v53, %v1239_v48  ;;  %v1162_v0 = vadd.f32 %v1875_v54, %v2232_v13 }
 0x20e   :  { %v1153_v60 = vpop.f32.mrf.mxu1  ;;  %v1531_v61 = vsel %vm1516_vm9, %v1415_v50, %v1530_v55  ;;  %v1419_v10 = vrot.slane %v1418_v63, 2  ;;  %v1427_v29 = vmax.f32 %v1425_v4, %v1426_v17 }
 0x20f   :  { %v1430_v62 = vmax.f32 %v1236_v56, %v1237_v57  ;;  %1545 = vst [vmem:[#allocation2 + $0x10] sm:$0xff] %v1531_v61  ;;  %v1154_v3 = vadd.f32 %v2232_v13, %v1153_v60  ;;  %v1438_v5 = vrot.slane %v1437_v59, 4  ;;  %v1242_v11 = vmax.f32 %v1162_v0, 0.0 }
 0x210   :  { %v1876_v1 = vpop.f32.mrf.mxu1  ;;  %v1420_v22 = vmax.f32 %v1418_v63, %v1419_v10  ;;  %v1428_v44 = vrot.slane %v1427_v29, 1 }
 0x211   :  { %v1431_v2 = vrot.slane %v1430_v62, 4  ;;  %v1165_v6 = vadd.f32 %v1876_v1, %v2232_v13  ;;  %v1240_v42 = vmax.f32 %v1154_v3, 0.0  ;;  %v1439_v18 = vmax.f32 %v1437_v59, %v1438_v5 }
 0x212   :  { %v1156_v7 = vpop.f32.mrf.mxu1  ;;  %v1421_v36 = vrot.slane %v1420_v22, 1  ;;  %v1429_v55 = vmax.f32 %v1427_v29, %v1428_v44 }
 0x213   :  { %v1432_v8 = vmax.f32 %v1430_v62, %v1431_v2  ;;  %v1157_v9 = vadd.f32 %v2232_v13, %v1156_v7  ;;  %v1243_v12 = vmax.f32 %v1165_v6, 0.0  ;;  %v1440_v30 = vrot.slane %v1439_v18, 2 }
 0x214   :  { %v1879_v14 = vpop.f32.mrf.mxu1  ;;  %v1422_v50 = vmax.f32 %v1420_v22, %v1421_v36 }
 0x215   :  { %v1433_v15 = vrot.slane %v1432_v8, 2  ;;  %v1241_v16 = vmax.f32 %v1157_v9, 0.0  ;;  %v1451_v19 = vmax.f32 %v1242_v11, %v1243_v12  ;;  %v1178_v24 = vadd.f32 %v1879_v14, %v2232_v13 }
 0x216   :  { %v1169_v20 = vpop.f32.mrf.mxu1  ;;  %v1441_v45 = vmax.f32 %v1439_v18, %v1440_v30  ;;  %v1532_v59 = vsel %vm1504_vm3, %v1429_v55, %v1422_v50 }
 0x217   :  { %v1444_v21 = vmax.f32 %v1240_v42, %v1241_v16  ;;  %v1452_v23 = vrot.slane %v1451_v19, 4  ;;  %v1434_v26 = vmax.f32 %v1432_v8, %v1433_v15  ;;  %v1170_v28 = vadd.f32 %v2232_v13, %v1169_v20 }
 0x218   :  { %v1880_v25 = vpop.f32.mrf.mxu1  ;;  %v1246_v37 = vmax.f32 %v1178_v24, 0.0 }
 0x219   :  { %v1445_v27 = vrot.slane %v1444_v21, 4  ;;  %v1453_v31 = vmax.f32 %v1451_v19, %v1452_v23  ;;  %v1181_v32 = vadd.f32 %v1880_v25, %v2232_v13  ;;  %v1435_v39 = vrot.slane %v1434_v26, 1 }
 0x21a   :  { %v1172_v33 = vpop.f32.mrf.mxu1  ;;  %v1244_v41 = vmax.f32 %v1170_v28, 0.0 }
 0x21b   :  { %v1446_v34 = vmax.f32 %v1444_v21, %v1445_v27  ;;  %v1173_v35 = vadd.f32 %v2232_v13, %v1172_v33  ;;  %v1247_v38 = vmax.f32 %v1181_v32, 0.0  ;;  %v1454_v46 = vrot.slane %v1453_v31, 2 }
 0x21c   :  { %v1436_v52 = vmax.f32 %v1434_v26, %v1435_v39  ;;  %v1442_v13 = vrot.slane %v1441_v45, 1 }
 0x21d   :  { %v1447_v40 = vrot.slane %v1446_v34, 2  ;;  %v1245_v43 = vmax.f32 %v1173_v35, 0.0  ;;  %v1465_v47 = vmax.f32 %v1246_v37, %v1247_v38  ;;  %v1455_v56 = vmax.f32 %v1453_v31, %v1454_v46 }
 0x21e   :  { %v1533_v61 = vsel %vm1506_vm4, %v1436_v52, %v1532_v59  ;;  %v1443_v0 = vmax.f32 %v1441_v45, %v1442_v13 }
 0x21f   :  { %v1448_v48 = vmax.f32 %v1446_v34, %v1447_v40  ;;  %v1458_v49 = vmax.f32 %v1244_v41, %v1245_v43  ;;  %v1466_v51 = vrot.slane %v1465_v47, 4  ;;  %v1456_v1 = vrot.slane %v1455_v56, 1 }
 0x220   :  { %v1534_v4 = vsel %vm1508_vm5, %v1443_v0, %v1533_v61 }
 0x221   :  { %v1449_v53 = vrot.slane %v1448_v48, 1  ;;  %v1459_v54 = vrot.slane %v1458_v49, 4  ;;  %v1467_v57 = vmax.f32 %v1465_v47, %v1466_v51  ;;  %v1457_v8 = vmax.f32 %v1455_v56, %v1456_v1 }
 0x223   :  { %v1460_v58 = vmax.f32 %v1458_v49, %v1459_v54  ;;  %v1468_v60 = vrot.slane %v1467_v57, 2  ;;  %v1450_v62 = vmax.f32 %v1448_v48, %v1449_v53 }
 0x225   :  { %v1461_v63 = vrot.slane %v1460_v58, 2  ;;  %v1469_v2 = vmax.f32 %v1467_v57, %v1468_v60  ;;  %v1535_v6 = vsel %vm1510_vm6, %v1450_v62, %v1534_v4 }
 0x226   :  { %v1536_v11 = vsel %vm1512_vm7, %v1457_v8, %v1535_v6 }
 0x227   :  { %v1462_v3 = vmax.f32 %v1460_v58, %v1461_v63  ;;  %v1470_v5 = vrot.slane %v1469_v2, 1 }
 0x229   :  { %v1463_v7 = vrot.slane %v1462_v3, 1  ;;  %v1471_v10 = vmax.f32 %v1469_v2, %v1470_v5 }
 0x22b   :  { %v1464_v9 = vmax.f32 %v1462_v3, %v1463_v7 }
 0x22d   :  { %v1537_v12 = vsel %vm1514_vm8, %v1464_v9, %v1536_v11 }
 0x22e   :  { %v1538_v14 = vsel %vm1516_vm9, %v1471_v10, %v1537_v12 }
 0x22f   :  { %1546 = vst [vmem:[#allocation2 + $0x18] sm:$0xff] %v1538_v14 }
 0x230   :  { %1935 = shalt.err (!%p1932_p4)
}
 0x231   :  { %s1947_s21 = smov 128   ;;  %s1948_s22 = smov 8  }
 0x232   :  { %1558 = dma.vmem_to_hbm [thread:$0]  %s1553_s19, 512, %s2334_s5, [#allocation3], %s1947_s21, %s1947_s21, %s1948_s22  }
 0x233   :  { %1944 = dma.done.wait [#allocation3], 512  }
 0x234   :  { %1945 = vsyncadd [#allocation3], 4294966784 }
 0x235   :  { %1562 = vsyncpa [#allocation3], 1 }

</bundles_post_ra>
